<compile_context>
chip_gen: v7x
topology: tpu7x:2x2x1
jax: 0.10.0
libtpu: 0.0.40
codegen_flags: <defaults>
</compile_context>

<pallas_src>
import functools

import jax
import jax.numpy as jnp
from jax.experimental import pallas as pl
from jax.experimental.pallas import tpu as pltpu

_LANES = 128
_SUBLANES = 8


def _round_up(x, m):
    return (x + m - 1) // m * m


def _mlp_kernel(x_ref, w1_ref, b1_ref, w2_ref, b2_ref, w3_ref, b3_ref, o_ref):
    """Fused 3-layer MLP for one row tile of x.

    x_ref : (TM, C)  f32        w1_ref : (C,   H1p) bf16   b1_ref : (1, H1p) f32
                                w2_ref : (H1p, H2p) bf16   b2_ref : (1, H2p) f32
                                w3_ref : (H2p, O)   bf16   b3_ref : (1, O)   f32
    o_ref : (TM, O) f32   (H1p/H2p lane-padded to 128; O left at its true size)
    """
    cdt = w1_ref.dtype  # compute (MXU operand) dtype, bf16 by default

    # lin1 + ReLU (MXU matmul, f32 accumulate). Padded weight columns stay 0.
    x = x_ref[...].astype(cdt)
    h1 = jnp.dot(x, w1_ref[...], preferred_element_type=jnp.float32) + b1_ref[...]
    h1 = jnp.maximum(h1, 0.0)
    # dropout(p=0.5, training=False) -> identity
    # TODO(synk): training-mode dropout (pltpu.prng_random_bits mask) not emitted; eval semantics only.

    # lin2 + ReLU
    h2 = jnp.dot(h1.astype(cdt), w2_ref[...], preferred_element_type=jnp.float32) + b2_ref[...]
    h2 = jnp.maximum(h2, 0.0)
    # dropout(p=0.5, training=False) -> identity

    # lin3 (no activation); direct (TM, O) store, no lane padding written back.
    out = jnp.dot(h2.astype(cdt), w3_ref[...], preferred_element_type=jnp.float32) + b3_ref[...]
    o_ref[...] = out.astype(o_ref.dtype)


def prepare_discriminator_params(w1, b1, w2, b2, w3, b3, compute_dtype=jnp.bfloat16):
    """One-time weight prep (hoisted out of the per-call path).

    Weights stored as [in, out], cast to `compute_dtype`, hidden dims zero-padded
    to 128 lanes. Biases stay f32. lin3's output dim is NOT padded.
    """
    C, H1 = w1.shape
    H2 = w2.shape[1]
    O = w3.shape[1]
    H1p = _round_up(H1, _LANES)
    H2p = _round_up(H2, _LANES)

    w1p = jnp.zeros((C, H1p), compute_dtype).at[:, :H1].set(w1.astype(compute_dtype))
    b1p = jnp.zeros((1, H1p), jnp.float32).at[0, :H1].set(b1.astype(jnp.float32))
    w2p = jnp.zeros((H1p, H2p), compute_dtype).at[:H1, :H2].set(w2.astype(compute_dtype))
    b2p = jnp.zeros((1, H2p), jnp.float32).at[0, :H2].set(b2.astype(jnp.float32))
    w3p = jnp.zeros((H2p, O), compute_dtype).at[:H2, :].set(w3.astype(compute_dtype))
    b3p = jnp.asarray(b3, jnp.float32).reshape(1, O)
    return (w1p, b1p, w2p, b2p, w3p, b3p)


@functools.partial(jax.jit, static_argnames=("tile_m",))
def discriminator_forward(x, params, *, tile_m=2048):
    """x: [N, C] float; params from prepare_discriminator_params. Returns [N, O] f32."""
    w1p, b1p, w2p, b2p, w3p, b3p = params
    N, C = x.shape
    H1p = w1p.shape[1]
    H2p = w2p.shape[1]
    O = w3p.shape[1]

    # Row tile: single step for small N, otherwise large tiles (amortize the
    # ~0.35us/step overhead); many steps + "parallel" lets v7x shard across TCs.
    tm = max(_SUBLANES, min(tile_m, _round_up(N, _SUBLANES)))
    grid = (pl.cdiv(N, tm),)  # ragged last block handled by Pallas (masked write)

    flops = 2 * N * (C * H1p + H1p * H2p + H2p * O)
    bytes_accessed = (
        x.dtype.itemsize * N * C                      # x read
        + 4 * N * O                                   # f32 output write
        + w1p.dtype.itemsize * (w1p.size + w2p.size + w3p.size)
        + 4 * (b1p.size + b2p.size + b3p.size)
    )

    out = pl.pallas_call(
        _mlp_kernel,
        out_shape=jax.ShapeDtypeStruct((N, O), jnp.float32),
        grid_spec=pltpu.PrefetchScalarGridSpec(
            num_scalar_prefetch=0,
            grid=grid,
            in_specs=[
                # x: tile rows, full (small) feature dim
                pl.BlockSpec((tm, C), lambda i: (i, 0)),
                # weights / biases: full arrays, resident across the grid
                pl.BlockSpec((C, H1p), lambda i: (0, 0)),
                pl.BlockSpec((1, H1p), lambda i: (0, 0)),
                pl.BlockSpec((H1p, H2p), lambda i: (0, 0)),
                pl.BlockSpec((1, H2p), lambda i: (0, 0)),
                pl.BlockSpec((H2p, O), lambda i: (0, 0)),
                pl.BlockSpec((1, O), lambda i: (0, 0)),
            ],
            # (tm, O): last block dim == full array dim -> legal; no lane padding
            # is written back to HBM.
            out_specs=pl.BlockSpec((tm, O), lambda i: (i, 0)),
        ),
        compiler_params=pltpu.CompilerParams(
            dimension_semantics=("parallel",),
            vmem_limit_bytes=32 * 1024 * 1024,
        ),
        cost_estimate=pl.CostEstimate(
            flops=flops, transcendentals=0, bytes_accessed=bytes_accessed
        ),
    )(x, w1p, b1p, w2p, b2p, w3p, b3p)
    return out


def _init_linear(key, fan_in, fan_out):
    """Deterministic init mimicking torch.nn.Linear default:
    W, b ~ U(-1/sqrt(fan_in), 1/sqrt(fan_in)). W stored as [in, out]."""
    kw, kb = jax.random.split(key)
    bound = 1.0 / jnp.sqrt(jnp.float32(fan_in))
    w = jax.random.uniform(kw, (fan_in, fan_out), jnp.float32, -bound, bound)
    b = jax.random.uniform(kb, (fan_out,), jnp.float32, -bound, bound)
    return w, b


def _reference_forward(x, w1, b1, w2, b2, w3, b3, compute_dtype=jnp.bfloat16):
    """Pure-JAX reference with the same bf16-operand / f32-accumulate precision."""
    cdt = compute_dtype
    h = jnp.dot(x.astype(cdt), w1.astype(cdt), preferred_element_type=jnp.float32) + b1
    h = jnp.maximum(h, 0.0)
    h = jnp.dot(h.astype(cdt), w2.astype(cdt), preferred_element_type=jnp.float32) + b2
    h = jnp.maximum(h, 0.0)
    return jnp.dot(h.astype(cdt), w3.astype(cdt), preferred_element_type=jnp.float32) + b3


if __name__ == "__main__":
    # Shapes consistent with the module's forward:
    #   in_channels=32, hidden_channels1=64, hidden_channels2=32, out_channels=16
    N, C, H1, H2, O = 40, 32, 64, 32, 16

    key = jax.random.PRNGKey(0)
    kx, k1, k2, k3 = jax.random.split(key, 4)

    x = jax.random.normal(kx, (N, C), jnp.float32)
    w1, b1 = _init_linear(k1, C, H1)
    w2, b2 = _init_linear(k2, H1, H2)
    w3, b3 = _init_linear(k3, H2, O)

    params = prepare_discriminator_params(w1, b1, w2, b2, w3, b3)
    ref = _reference_forward(x, w1, b1, w2, b2, w3, b3)

    # 1) Default path: single grid step (N <= tile_m).
    out = jax.block_until_ready(discriminator_forward(x, params))
    assert out.shape == (N, O)
    assert jnp.allclose(out, ref, atol=2e-3, rtol=2e-3), "mismatch vs reference (single tile)"

    # 2) Multi-step + ragged last block path (tm=16, grid=3, last block partial).
    out2 = jax.block_until_ready(discriminator_forward(x, params, tile_m=16))
    assert out2.shape == (N, O)
    assert jnp.allclose(out2, ref, atol=2e-3, rtol=2e-3), "mismatch vs reference (ragged tiles)"

    print("KERNEL_OK")
</pallas_src>

<mosaic_0001>
module attributes {stable_mosaic.version = 11 : i64} {
  func.func @_mlp_kernel(%arg0: i32, %arg1: memref<40x32xf32, #tpu.memory_space<vmem>>, %arg2: memref<32x128xbf16, #tpu.memory_space<vmem>>, %arg3: memref<1x128xf32, #tpu.memory_space<vmem>>, %arg4: memref<128x128xbf16, #tpu.memory_space<vmem>>, %arg5: memref<1x128xf32, #tpu.memory_space<vmem>>, %arg6: memref<128x16xbf16, #tpu.memory_space<vmem>>, %arg7: memref<1x16xf32, #tpu.memory_space<vmem>>, %arg8: memref<40x16xf32, #tpu.memory_space<vmem>>) attributes {dimension_semantics = [#tpu.dimension_semantics<parallel>], iteration_bounds = array<i64: 1>, scalar_prefetch = 0 : i64, scratch_operands = 0 : i64, tpu.core_type = #tpu.core_type<tc>, window_params = [{transform_indices = @transform_0, window_bounds = array<i64: 40, 32>}, {pipeline_mode = #tpu.pipeline_mode<synchronous>, transform_indices = @transform_1, window_bounds = array<i64: 32, 128>}, {pipeline_mode = #tpu.pipeline_mode<synchronous>, transform_indices = @transform_2, window_bounds = array<i64: 1, 128>}, {pipeline_mode = #tpu.pipeline_mode<synchronous>, transform_indices = @transform_3, window_bounds = array<i64: 128, 128>}, {pipeline_mode = #tpu.pipeline_mode<synchronous>, transform_indices = @transform_4, window_bounds = array<i64: 1, 128>}, {pipeline_mode = #tpu.pipeline_mode<synchronous>, transform_indices = @transform_5, window_bounds = array<i64: 128, 16>}, {pipeline_mode = #tpu.pipeline_mode<synchronous>, transform_indices = @transform_6, window_bounds = array<i64: 1, 16>}, {transform_indices = @transform_7, window_bounds = array<i64: 40, 16>}]} {
    %c0 = arith.constant 0 : index
    %c0_0 = arith.constant 0 : index
    %0 = vector.load %arg1[%c0, %c0_0] : memref<40x32xf32, #tpu.memory_space<vmem>>, vector<40x32xf32>
    %1 = arith.truncf %0 : vector<40x32xf32> to vector<40x32xbf16>
    %c0_1 = arith.constant 0 : index
    %c0_2 = arith.constant 0 : index
    %2 = vector.load %arg2[%c0_1, %c0_2] : memref<32x128xbf16, #tpu.memory_space<vmem>>, vector<32x128xbf16>
    %cst = arith.constant dense<0.000000e+00> : vector<40x128xf32>
    %3 = tpu.matmul %1, %2, %cst {dimension_numbers = #tpu.dot_dimension_numbers<[1], [0], [0], [1], [0, 0, 1, 1], [], []>} : vector<40x32xbf16>, vector<32x128xbf16>, vector<40x128xf32> -> vector<40x128xf32>
    %c0_3 = arith.constant 0 : index
    %c0_4 = arith.constant 0 : index
    %4 = vector.load %arg3[%c0_3, %c0_4] : memref<1x128xf32, #tpu.memory_space<vmem>>, vector<1x128xf32>
    %5 = vector.broadcast %4 : vector<1x128xf32> to vector<40x128xf32>
    %6 = arith.addf %3, %5 : vector<40x128xf32>
    %cst_5 = arith.constant 0.000000e+00 : f32
    %7 = vector.broadcast %cst_5 : f32 to vector<40x128xf32>
    %8 = arith.maximumf %6, %7 : vector<40x128xf32>
    %9 = arith.truncf %8 : vector<40x128xf32> to vector<40x128xbf16>
    %c0_6 = arith.constant 0 : index
    %c0_7 = arith.constant 0 : index
    %10 = vector.load %arg4[%c0_6, %c0_7] : memref<128x128xbf16, #tpu.memory_space<vmem>>, vector<128x128xbf16>
    %cst_8 = arith.constant dense<0.000000e+00> : vector<40x128xf32>
    %11 = tpu.matmul %9, %10, %cst_8 {dimension_numbers = #tpu.dot_dimension_numbers<[1], [0], [0], [1], [0, 0, 1, 1], [], []>} : vector<40x128xbf16>, vector<128x128xbf16>, vector<40x128xf32> -> vector<40x128xf32>
    %c0_9 = arith.constant 0 : index
    %c0_10 = arith.constant 0 : index
    %12 = vector.load %arg5[%c0_9, %c0_10] : memref<1x128xf32, #tpu.memory_space<vmem>>, vector<1x128xf32>
    %13 = vector.broadcast %12 : vector<1x128xf32> to vector<40x128xf32>
    %14 = arith.addf %11, %13 : vector<40x128xf32>
    %cst_11 = arith.constant 0.000000e+00 : f32
    %15 = vector.broadcast %cst_11 : f32 to vector<40x128xf32>
    %16 = arith.maximumf %14, %15 : vector<40x128xf32>
    %17 = arith.truncf %16 : vector<40x128xf32> to vector<40x128xbf16>
    %c0_12 = arith.constant 0 : index
    %c0_13 = arith.constant 0 : index
    %18 = vector.load %arg6[%c0_12, %c0_13] : memref<128x16xbf16, #tpu.memory_space<vmem>>, vector<128x16xbf16>
    %cst_14 = arith.constant dense<0.000000e+00> : vector<40x16xf32>
    %19 = tpu.matmul %17, %18, %cst_14 {dimension_numbers = #tpu.dot_dimension_numbers<[1], [0], [0], [1], [0, 0, 1, 1], [], []>} : vector<40x128xbf16>, vector<128x16xbf16>, vector<40x16xf32> -> vector<40x16xf32>
    %c0_15 = arith.constant 0 : index
    %c0_16 = arith.constant 0 : index
    %20 = vector.load %arg7[%c0_15, %c0_16] : memref<1x16xf32, #tpu.memory_space<vmem>>, vector<1x16xf32>
    %21 = vector.broadcast %20 : vector<1x16xf32> to vector<40x16xf32>
    %22 = arith.addf %19, %21 : vector<40x16xf32>
    %c0_17 = arith.constant 0 : index
    %c0_18 = arith.constant 0 : index
    %23 = vector.load %arg8[%c0_17, %c0_18] : memref<40x16xf32, #tpu.memory_space<vmem>>, vector<40x16xf32>
    tpu.vector_store %arg8[%c0_17, %c0_18], %22 {strides = array<i32>} : memref<40x16xf32, #tpu.memory_space<vmem>>, vector<40x16xf32>,
    return
  }
  func.func @transform_0(%arg0: i32) -> (i32, i32) {
    %c0_i32 = arith.constant 0 : i32
    %c0_i32_0 = arith.constant 0 : i32
    return %arg0, %c0_i32 : i32, i32
  }
  func.func @transform_1(%arg0: i32) -> (i32, i32) {
    %c0_i32 = arith.constant 0 : i32
    %c0_i32_0 = arith.constant 0 : i32
    %c0_i32_1 = arith.constant 0 : i32
    return %c0_i32, %c0_i32_0 : i32, i32
  }
  func.func @transform_2(%arg0: i32) -> (i32, i32) {
    %c0_i32 = arith.constant 0 : i32
    %c0_i32_0 = arith.constant 0 : i32
    %c0_i32_1 = arith.constant 0 : i32
    return %c0_i32, %c0_i32_0 : i32, i32
  }
  func.func @transform_3(%arg0: i32) -> (i32, i32) {
    %c0_i32 = arith.constant 0 : i32
    %c0_i32_0 = arith.constant 0 : i32
    %c0_i32_1 = arith.constant 0 : i32
    return %c0_i32, %c0_i32_0 : i32, i32
  }
  func.func @transform_4(%arg0: i32) -> (i32, i32) {
    %c0_i32 = arith.constant 0 : i32
    %c0_i32_0 = arith.constant 0 : i32
    %c0_i32_1 = arith.constant 0 : i32
    return %c0_i32, %c0_i32_0 : i32, i32
  }
  func.func @transform_5(%arg0: i32) -> (i32, i32) {
    %c0_i32 = arith.constant 0 : i32
    %c0_i32_0 = arith.constant 0 : i32
    %c0_i32_1 = arith.constant 0 : i32
    return %c0_i32, %c0_i32_0 : i32, i32
  }
  func.func @transform_6(%arg0: i32) -> (i32, i32) {
    %c0_i32 = arith.constant 0 : i32
    %c0_i32_0 = arith.constant 0 : i32
    %c0_i32_1 = arith.constant 0 : i32
    return %c0_i32, %c0_i32_0 : i32, i32
  }
  func.func @transform_7(%arg0: i32) -> (i32, i32) {
    %c0_i32 = arith.constant 0 : i32
    %c0_i32_0 = arith.constant 0 : i32
    return %arg0, %c0_i32 : i32, i32
  }
}

</mosaic_0001>

<bundles_post_ra>
// kernel: discriminator_forward.1
= control target key start
LH: loop header
LB: loop body
LE: loop exit
PB: predicated region body
PF: predicated region fallthrough
CT: control target
= control target key end

     0   :  { %v547_v0 = vmov 0.0   ;;  %vm548_vm0 = vmmov 0   ;;  %vm58_vm1 = vcmask 261120   ;;  %vm394_vm2 = vcmask 130048   ;;  %s726_s1 = inlined_call_operand.vmem [shape: bf16[32,128], index: 1, kind: input, shape index: {}]   ;;  %s727_s0 = inlined_call_operand.vmem [shape: f32[40,32], index: 0, kind: input, shape index: {}]   ;;  %s728_s3 = inlined_call_operand.vmem [shape: bf16[128,128], index: 3, kind: input, shape index: {}]   ;;  %s729_s5 = inlined_call_operand.vmem [shape: bf16[128,16], index: 5, kind: input, shape index: {}]   ;;  %s730_s2 = inlined_call_operand.vmem [shape: f32[1,128], index: 2, kind: input, shape index: {}]   ;;  %s731_s4 = inlined_call_operand.vmem [shape: f32[1,128], index: 4, kind: input, shape index: {}]   ;;  %s732_s6 = inlined_call_operand.vmem [shape: f32[1,16], index: 6, kind: input, shape index: {}]   ;;  %s733_s7 = inlined_call_operand.vmem [shape: f32[40,16], index: 7, kind: output, shape index: {}]  }
   0x1   :  { %455 = vmatprep.subr.bf16.mxu0 %v547_v0  ;;  %v529_v1 = vld [vmem:[%s726_s1] sm:$0xff]   ;;  %459 = vmatprep.mubr.msk.bf16.mxu0 %vm548_vm0, %v547_v0  ;;  %v530_v2 = vld [vmem:[%s726_s1 + $0x8] sm:$0xff]   ;;  %v29_v8 = vld [vmem:[%s727_s0 + $0x10] sm:$0xff] }
   0x2   :  { %471 = vmatprep.subr.bf16.mxu1 %v547_v0  ;;  %487 = vmatprep.mubr.msk.bf16.mxu1 %vm548_vm0, %v547_v0  ;;  %v27_v3 = vld [vmem:[%s727_s0] sm:$0xff]  ;;  %v28_v4 = vld [vmem:[%s727_s0 + $0x8] sm:$0xff]  ;;  %v30_v9 = vld [vmem:[%s727_s0 + $0x18] sm:$0xff] }
   0x3   :  { %456 = vmatpush3.bf16.msra.mxu0 %v529_v1  ;;  %v531_v5 = vld [vmem:[%s728_s3] sm:$0xff]   ;;  %v32_v6 = vpack.c.bf16 %v28_v4, %v27_v3  ;;  %v532_v7 = vld [vmem:[%s728_s3 + $0x8] sm:$0xff]   ;;  %v533_v10 = vld [vmem:[%s728_s3 + $0x10] sm:$0xff]   ;;  %v33_v11 = vpack.c.bf16 %v30_v9, %v29_v8 }
   0x4   :  { %457 = vmatprep.subr.bf16.mxu0 %v547_v0  ;;  %472 = vmatpush3.bf16.msra.mxu1 %v531_v5  ;;  %v534_v12 = vld [vmem:[%s728_s3 + $0x18] sm:$0xff]   ;;  %v31_v13 = vld [vmem:[%s727_s0 + $0x20] sm:$0xff]  ;;  %v536_v16 = vld [vmem:[%s728_s3 + $0x28] sm:$0xff]  }
   0x5   :  { %473 = vmatprep.subr.bf16.mxu1 %v547_v0  ;;  %v535_v14 = vld [vmem:[%s728_s3 + $0x20] sm:$0xff]   ;;  %v34_v15 = vpack.c.bf16 %v31_v13, %v31_v13  ;;  %v537_v17 = vld [vmem:[%s728_s3 + $0x30] sm:$0xff]   ;;  %v538_v18 = vld [vmem:[%s728_s3 + $0x38] sm:$0xff]  }
   0x6   :  { %v539_v19 = vld [vmem:[%s729_s5] sm:$0xff]   ;;  %v540_v20 = vld [vmem:[%s729_s5 + $0x8] sm:$0xff]   ;;  %v541_v21 = vld [vmem:[%s729_s5 + $0x10] sm:$0xff]  }
   0x7   :  { %458 = vmatpush3.bf16.msra.mxu0 %v530_v2  ;;  %v542_v22 = vld [vmem:[%s729_s5 + $0x18] sm:$0xff]   ;;  %v543_v23 = vld [vmem:[%s729_s5 + $0x20] sm:$0xff]   ;;  %v544_v24 = vld [vmem:[%s729_s5 + $0x28] sm:$0xff]  }
   0x8   :  { %499 = vmatprep.subr.bf16.mxu0 %v547_v0  ;;  %474 = vmatpush3.bf16.msra.mxu1 %v532_v7  ;;  %v404_v25 = vld [vmem:[%s730_s2] ss:$0 sm:$0xff]  ;;  %v545_v51 = vld [vmem:[%s729_s5 + $0x30] sm:$0xff]   ;;  %v546_v52 = vld [vmem:[%s729_s5 + $0x38] sm:$0xff]  }
   0x9   :  { %475 = vmatprep.subr.bf16.mxu1 %v547_v0  ;;  %v410_v53 = vld [vmem:[%s731_s4] ss:$0 sm:$0xff] }
   0xa   :  { %460 = vmatmul.mubr.msk.bf16.vlgmr.msra.gmra.mrb[0].mxu0 %vm58_vm1, %v32_v6 }
   0xb   :  { %463 = vmatprep.mubr.msk.bf16.mxu0 %vm548_vm0, %v547_v0  ;;  %500 = vmatpush3.bf16.msra.mxu0 %v539_v19 }
   0xc   :  { %476 = vmatpush3.bf16.msra.mxu1 %v533_v10  ;;  %501 = vmatprep.subr.bf16.mxu0 %v547_v0 }
   0xd   :  { %477 = vmatprep.subr.bf16.mxu1 %v547_v0 }
   0xf   :  { %502 = vmatpush3.bf16.msra.mxu0 %v540_v20 }
  0x10   :  { %478 = vmatpush3.bf16.msra.mxu1 %v534_v12  ;;  %503 = vmatprep.subr.bf16.mxu0 %v547_v0 }
  0x11   :  { %479 = vmatprep.subr.bf16.mxu1 %v547_v0 }
  0x12   :  { %464 = vmatmul.mubr.msk.bf16.gmra.mrb[4].mxu0 %vm58_vm1, %v33_v11 }
  0x13   :  { %467 = vmatprep.mubr.msk.bf16.mxu0 %vm548_vm0, %v547_v0  ;;  %504 = vmatpush3.bf16.msra.mxu0 %v541_v21 }
  0x14   :  { %480 = vmatpush3.bf16.msra.mxu1 %v535_v14  ;;  %505 = vmatprep.subr.bf16.mxu0 %v547_v0 }
  0x15   :  { %481 = vmatprep.subr.bf16.mxu1 %v547_v0 }
  0x17   :  { %506 = vmatpush3.bf16.msra.mxu0 %v542_v22 }
  0x18   :  { %482 = vmatpush3.bf16.msra.mxu1 %v536_v16  ;;  %507 = vmatprep.subr.bf16.mxu0 %v547_v0  ;;  %v419_v16 = vld [vmem:[%s732_s6] ss:$0 sm:$0xff] }
  0x19   :  { %483 = vmatprep.subr.bf16.mxu1 %v547_v0 }
  0x1a   :  { %468 = vmatmul.mubr.msk.bf16.gmra.mrb[8].mxu0 %vm58_vm1, %v34_v15 }
  0x1b   :  { %515 = vmatprep.mubr.msk.bf16.mxu0 %vm548_vm0, %v547_v0  ;;  %508 = vmatpush3.bf16.msra.mxu0 %v543_v23 }
  0x1c   :  { %484 = vmatpush3.bf16.msra.mxu1 %v537_v17  ;;  %509 = vmatprep.subr.bf16.mxu0 %v547_v0 }
  0x1d   :  { %485 = vmatprep.subr.bf16.mxu1 %v547_v0 }
  0x1f   :  { %510 = vmatpush3.bf16.msra.mxu0 %v544_v24 }
  0x20   :  { %486 = vmatpush3.bf16.msra.mxu1 %v538_v18  ;;  %511 = vmatprep.subr.bf16.mxu0 %v547_v0 }
  0x23   :  { %512 = vmatpush3.bf16.msra.mxu0 %v545_v51 }
  0x24   :  { %513 = vmatprep.subr.bf16.mxu0 %v547_v0 }
  0x27   :  { %514 = vmatpush3.bf16.msra.mxu0 %v546_v52 }
  0xdd   :  { %v102_v26 = vpop.f32.mrb[0].mxu0 }
  0xde   :  { %v103_v27 = vadd.f32 %v404_v25, %v102_v26  ;;  %v461_v28 = vpop.f32.mrb[1].mxu0 }
  0xdf   :  { %v105_v29 = vpop.f32.mrb[2].mxu0 }
  0xe0   :  { %v106_v30 = vadd.f32 %v404_v25, %v105_v29  ;;  %v462_v31 = vpop.f32.mrb[3].mxu0  ;;  %v124_v32 = vmax.f32 %v103_v27, 0.0 }
  0xe2   :  { %v125_v33 = vmax.f32 %v106_v30, 0.0 }
  0xe4   :  { %v129_v34 = vpack.c.bf16 %v125_v33, %v124_v32 }
  0xe5   :  { %v110_v35 = vpop.f32.mrb[4].mxu0 }
  0xe6   :  { %v111_v36 = vadd.f32 %v404_v25, %v110_v35  ;;  %v465_v37 = vpop.f32.mrb[5].mxu0  ;;  %488 = vmatmul.mubr.bf16.vlgmr.msra.gmra.mrb[0].mxu1 %v129_v34 }
  0xe7   :  { %v113_v38 = vpop.f32.mrb[6].mxu0  ;;  %491 = vmatprep.mubr.msk.bf16.mxu1 %vm548_vm0, %v547_v0 }
  0xe8   :  { %v114_v39 = vadd.f32 %v404_v25, %v113_v38  ;;  %v466_v40 = vpop.f32.mrb[7].mxu0  ;;  %v126_v41 = vmax.f32 %v111_v36, 0.0 }
  0xea   :  { %v127_v42 = vmax.f32 %v114_v39, 0.0 }
  0xec   :  { %v130_v43 = vpack.c.bf16 %v127_v42, %v126_v41 }
  0xed   :  { %v118_v44 = vpop.f32.mrb[8].mxu0 }
  0xee   :  { %v119_v45 = vadd.f32 %v404_v25, %v118_v44  ;;  %492 = vmatmul.mubr.bf16.gmra.mrb[4].mxu1 %v130_v43  ;;  %v469_v46 = vpop.f32.mrb[9].mxu0 }
  0xef   :  { %v121_v47 = vpop.f32.mrb[10].mxu0  ;;  %495 = vmatprep.mubr.msk.bf16.mxu1 %vm548_vm0, %v547_v0 }
  0xf0   :  { %v128_v48 = vmax.f32 %v119_v45, 0.0  ;;  %v470_v49 = vpop.f32.mrb[11].mxu0 }
  0xf2   :  { %v131_v50 = vpack.c.bf16 %v128_v48, %v128_v48 }
  0xf6   :  { %496 = vmatmul.mubr.bf16.gmra.mrb[8].mxu1 %v131_v50 }
 0x1b9   :  { %v237_v54 = vpop.f32.mrb[0].mxu1 }
 0x1ba   :  { %v238_v55 = vadd.f32 %v410_v53, %v237_v54  ;;  %v489_v56 = vpop.f32.mrb[1].mxu1 }
 0x1bb   :  { %v240_v57 = vpop.f32.mrb[2].mxu1 }
 0x1bc   :  { %v241_v58 = vadd.f32 %v410_v53, %v240_v57  ;;  %v490_v59 = vpop.f32.mrb[3].mxu1  ;;  %v259_v60 = vmax.f32 %v238_v55, 0.0 }
 0x1be   :  { %v260_v61 = vmax.f32 %v241_v58, 0.0 }
 0x1c0   :  { %v264_v62 = vpack.c.bf16 %v260_v61, %v259_v60 }
 0x1c1   :  { %v245_v63 = vpop.f32.mrb[4].mxu1 }
 0x1c2   :  { %v246_v1 = vadd.f32 %v410_v53, %v245_v63  ;;  %v493_v2 = vpop.f32.mrb[5].mxu1  ;;  %516 = vmatmul.mubr.bf16.vlgmr.msra.gmra.mrb[12].mxu0 %v264_v62 }
 0x1c3   :  { %v248_v3 = vpop.f32.mrb[6].mxu1  ;;  %519 = vmatprep.mubr.msk.bf16.mxu0 %vm548_vm0, %v547_v0 }
 0x1c4   :  { %v249_v4 = vadd.f32 %v410_v53, %v248_v3  ;;  %v494_v5 = vpop.f32.mrb[7].mxu1  ;;  %v261_v6 = vmax.f32 %v246_v1, 0.0 }
 0x1c6   :  { %v262_v7 = vmax.f32 %v249_v4, 0.0 }
 0x1c8   :  { %v265_v8 = vpack.c.bf16 %v262_v7, %v261_v6 }
 0x1c9   :  { %v253_v9 = vpop.f32.mrb[8].mxu1 }
 0x1ca   :  { %v254_v10 = vadd.f32 %v410_v53, %v253_v9  ;;  %v497_v11 = vpop.f32.mrb[9].mxu1  ;;  %520 = vmatmul.mubr.bf16.gmra.mrb[16].mxu0 %v265_v8 }
 0x1cb   :  { %v256_v12 = vpop.f32.mrb[10].mxu1  ;;  %523 = vmatprep.mubr.msk.bf16.mxu0 %vm548_vm0, %v547_v0 }
 0x1cc   :  { %v263_v13 = vmax.f32 %v254_v10, 0.0  ;;  %v498_v14 = vpop.f32.mrb[11].mxu1 }
 0x1ce   :  { %v266_v15 = vpack.c.bf16 %v263_v13, %v263_v13 }
 0x1d2   :  { %524 = vmatmul.mubr.bf16.gmra.mrb[20].mxu0 %v266_v15 }
 0x295   :  { %v372_v17 = vpop.f32.mrb[12].mxu0 }
 0x296   :  { %v373_v18 = vadd.f32 %v419_v16, %v372_v17  ;;  %v517_v19 = vpop.f32.mrb[13].mxu0 }
 0x297   :  { %v375_v20 = vpop.f32.mrb[14].mxu0 }
 0x298   :  { %395 = vst.msk [vmem:[%s733_s7] sm:$0xff] %vm394_vm2, %v373_v18  ;;  %v376_v21 = vadd.f32 %v419_v16, %v375_v20  ;;  %v518_v0 = vpop.f32.mrb[15].mxu0 }
 0x29a   :  { %396 = vst.msk [vmem:[%s733_s7 + $0x8] sm:$0xff] %vm394_vm2, %v376_v21 }
 0x29d   :  { %v380_v22 = vpop.f32.mrb[16].mxu0 }
 0x29e   :  { %v381_v23 = vadd.f32 %v419_v16, %v380_v22  ;;  %v521_v24 = vpop.f32.mrb[17].mxu0 }
 0x29f   :  { %v383_v25 = vpop.f32.mrb[18].mxu0 }
 0x2a0   :  { %397 = vst.msk [vmem:[%s733_s7 + $0x10] sm:$0xff] %vm394_vm2, %v381_v23  ;;  %v384_v26 = vadd.f32 %v419_v16, %v383_v25  ;;  %v522_v27 = vpop.f32.mrb[19].mxu0 }
 0x2a2   :  { %398 = vst.msk [vmem:[%s733_s7 + $0x18] sm:$0xff] %vm394_vm2, %v384_v26 }
 0x2a5   :  { %v388_v28 = vpop.f32.mrb[20].mxu0 }
 0x2a6   :  { %v389_v29 = vadd.f32 %v419_v16, %v388_v28  ;;  %v525_v30 = vpop.f32.mrb[21].mxu0 }
 0x2a7   :  { %v391_v31 = vpop.f32.mrb[22].mxu0 }
 0x2a8   :  { %399 = vst.msk [vmem:[%s733_s7 + $0x20] sm:$0xff] %vm394_vm2, %v389_v29  ;;  %v526_v32 = vpop.f32.mrb[23].mxu0 }

</bundles_post_ra>
